<compile_context>
chip_gen: v7x
topology: tpu7x:2x2x1
jax: 0.10.0
libtpu: 0.0.40
codegen_flags: <defaults>
</compile_context>

<pallas_src>
import jax
import jax.numpy as jnp
from jax.experimental import pallas as pl
from jax.experimental.pallas import tpu as pltpu


def _normalize_kernel(x_ref, mu_ref, inv_ref, o_ref):
    # x_ref:   (TM, TN)  input tile
    # mu_ref:  (1,  TN)  per-feature mean (float32)
    # inv_ref: (1,  TN)  per-feature 1 / clamp(std, tol) (float32)
    x = x_ref[...].astype(jnp.float32)
    o_ref[...] = ((x - mu_ref[...]) * inv_ref[...]).astype(o_ref.dtype)


def _normalize_2d(x, mu_f32, inv_f32, *, target_tile_bytes, block_rows=None,
                  block_cols=None):
    """(x - mu) * inv over a [N, D] array, mu/inv broadcast over rows."""
    n, d = x.shape
    itemsize = jnp.dtype(x.dtype).itemsize
    sub = {4: 8, 2: 16, 1: 32}.get(itemsize, 8)  # sublane packing multiple

    # --- column block: full D when it fits, else a lane-dense multiple of 128.
    if block_cols is None:
        max_cols = 2048 if itemsize <= 2 else 1024
        block_cols = d if d <= max_cols else max_cols

    # --- row block: sized so block_rows * block_cols * itemsize ~ target bytes.
    if block_rows is None:
        rows_for_target = max(target_tile_bytes // max(block_cols * itemsize, 1),
                              sub)
        rows_for_target = max((rows_for_target // sub) * sub, sub)
        block_rows = n if rows_for_target >= n else rows_for_target
    block_rows = min(block_rows, n)

    mu2 = mu_f32.reshape(1, d)
    inv2 = inv_f32.reshape(1, d)

    # Column axis OUTER, row axis INNER: stats block index is constant across
    # the inner row sweep, so mu/inv are not re-fetched every step.
    grid = (pl.cdiv(d, block_cols), pl.cdiv(n, block_rows))

    return pl.pallas_call(
        _normalize_kernel,
        out_shape=jax.ShapeDtypeStruct((n, d), x.dtype),
        grid_spec=pltpu.PrefetchScalarGridSpec(
            num_scalar_prefetch=0,
            grid=grid,
            in_specs=[
                pl.BlockSpec((block_rows, block_cols), lambda j, i: (i, j)),
                pl.BlockSpec((1, block_cols), lambda j, i: (0, j)),
                pl.BlockSpec((1, block_cols), lambda j, i: (0, j)),
            ],
            out_specs=pl.BlockSpec((block_rows, block_cols),
                                   lambda j, i: (i, j)),
        ),
        compiler_params=pltpu.CompilerParams(
            dimension_semantics=("parallel", "parallel"),
            vmem_limit_bytes=32 * 1024 * 1024,
        ),
    )(x, mu2, inv2)


def normalized_representation(x, mu, sigma, *, tol=1e-5,
                              target_tile_bytes=4 * 1024 * 1024,
                              block_rows=None, block_cols=None):
    """(x - mu) / clamp(sigma, tol), mu/sigma broadcast over rows of x[N, D]."""
    n, d = x.shape
    assert mu.shape == (d,) and sigma.shape == (d,)

    # Per-feature statistics in float32 (matches PyTorch fp32 stats path).
    # NOTE: NaN std propagates to NaN output, same as torch.clamp + divide.
    mu_f32 = mu.astype(jnp.float32)
    inv_sigma = 1.0 / jnp.maximum(sigma.astype(jnp.float32), jnp.float32(tol))

    # Lane-dense repack for narrow feature dims: if D < 128 and the repack is
    # free (pure reshape + tiny stat tile), present a 128-wide last dim so the
    # output stores are unmasked full-lane vst's.
    if d < 128 and 128 % d == 0 and (n * d) % 128 == 0 and block_cols is None:
        rep = 128 // d
        x2 = x.reshape((n * d) // 128, 128)
        out = _normalize_2d(x2, jnp.tile(mu_f32, rep), jnp.tile(inv_sigma, rep),
                            target_tile_bytes=target_tile_bytes,
                            block_rows=block_rows, block_cols=None)
        return out.reshape(n, d)

    return _normalize_2d(x, mu_f32, inv_sigma,
                         target_tile_bytes=target_tile_bytes,
                         block_rows=block_rows, block_cols=block_cols)


if __name__ == "__main__":
    key = jax.random.PRNGKey(0)
    k_x, k_mu, k_sigma, k_x2, k_x3 = jax.random.split(key, 5)

    TOL = 1e-5

    # --- Case 1: small, tile-aligned [samples, features] ---
    N, D = 16, 256
    x = jax.random.normal(k_x, (N, D), dtype=jnp.float32)
    mu = jax.random.normal(k_mu, (D,), dtype=jnp.float32)
    sigma = jnp.abs(jax.random.normal(k_sigma, (D,), dtype=jnp.float32))
    sigma = sigma.at[:4].set(1e-8)  # exercise the clamp path

    out = jax.block_until_ready(normalized_representation(x, mu, sigma, tol=TOL))
    ref = (x - mu[None, :]) / jnp.maximum(sigma, TOL)[None, :]
    assert out.shape == (N, D)
    assert jnp.allclose(out, ref, rtol=1e-5, atol=1e-6), "mismatch (case 1)"

    # --- Case 2: non-divisible rows + cols, exercises boundary-block masking
    #     (no pad/slice path anymore — Pallas masks the ragged edges). ---
    N2, D2 = 20, 200
    x2 = jax.random.normal(k_x2, (N2, D2), dtype=jnp.float32)
    mu2 = jnp.linspace(-1.0, 1.0, D2, dtype=jnp.float32)
    sigma2 = jnp.linspace(1e-8, 2.0, D2, dtype=jnp.float32)

    out2 = jax.block_until_ready(
        normalized_representation(x2, mu2, sigma2, tol=TOL,
                                  block_rows=16, block_cols=128))
    ref2 = (x2 - mu2[None, :]) / jnp.maximum(sigma2, TOL)[None, :]
    assert out2.shape == (N2, D2)
    assert jnp.allclose(out2, ref2, rtol=1e-5, atol=1e-6), "mismatch (case 2)"

    # --- Case 3: narrow feature dim (D < 128) -> lane-dense repack path ---
    N3, D3 = 32, 64
    x3 = jax.random.normal(k_x3, (N3, D3), dtype=jnp.float32)
    mu3 = jnp.linspace(-0.5, 0.5, D3, dtype=jnp.float32)
    sigma3 = jnp.linspace(1e-8, 3.0, D3, dtype=jnp.float32)

    out3 = jax.block_until_ready(
        normalized_representation(x3, mu3, sigma3, tol=TOL))
    ref3 = (x3 - mu3[None, :]) / jnp.maximum(sigma3, TOL)[None, :]
    assert out3.shape == (N3, D3)
    assert jnp.allclose(out3, ref3, rtol=1e-5, atol=1e-6), "mismatch (case 3)"

    print("KERNEL_OK")
</pallas_src>

<mosaic_0001>
module attributes {stable_mosaic.version = 11 : i64} {
  func.func @_normalize_kernel(%arg0: i32, %arg1: i32, %arg2: memref<16x256xf32, #tpu.memory_space<vmem>>, %arg3: memref<1x256xf32, #tpu.memory_space<vmem>>, %arg4: memref<1x256xf32, #tpu.memory_space<vmem>>, %arg5: memref<16x256xf32, #tpu.memory_space<vmem>>) attributes {dimension_semantics = [#tpu.dimension_semantics<parallel>, #tpu.dimension_semantics<parallel>], iteration_bounds = array<i64: 1, 1>, scalar_prefetch = 0 : i64, scratch_operands = 0 : i64, tpu.core_type = #tpu.core_type<tc>, window_params = [{transform_indices = @transform_0, window_bounds = array<i64: 16, 256>}, {transform_indices = @transform_1, window_bounds = array<i64: 1, 256>}, {transform_indices = @transform_2, window_bounds = array<i64: 1, 256>}, {transform_indices = @transform_3, window_bounds = array<i64: 16, 256>}]} {
    %c0 = arith.constant 0 : index
    %c0_0 = arith.constant 0 : index
    %0 = vector.load %arg2[%c0, %c0_0] : memref<16x256xf32, #tpu.memory_space<vmem>>, vector<16x256xf32>
    %c0_1 = arith.constant 0 : index
    %c0_2 = arith.constant 0 : index
    %1 = vector.load %arg3[%c0_1, %c0_2] : memref<1x256xf32, #tpu.memory_space<vmem>>, vector<1x256xf32>
    %2 = vector.broadcast %1 : vector<1x256xf32> to vector<16x256xf32>
    %3 = arith.subf %0, %2 : vector<16x256xf32>
    %c0_3 = arith.constant 0 : index
    %c0_4 = arith.constant 0 : index
    %4 = vector.load %arg4[%c0_3, %c0_4] : memref<1x256xf32, #tpu.memory_space<vmem>>, vector<1x256xf32>
    %5 = vector.broadcast %4 : vector<1x256xf32> to vector<16x256xf32>
    %6 = arith.mulf %3, %5 : vector<16x256xf32>
    %c0_5 = arith.constant 0 : index
    %c0_6 = arith.constant 0 : index
    %7 = vector.load %arg5[%c0_5, %c0_6] : memref<16x256xf32, #tpu.memory_space<vmem>>, vector<16x256xf32>
    tpu.vector_store %arg5[%c0_5, %c0_6], %6 {strides = array<i32>} : memref<16x256xf32, #tpu.memory_space<vmem>>, vector<16x256xf32>,
    return
  }
  func.func @transform_0(%arg0: i32, %arg1: i32) -> (i32, i32) {
    %c0_i32 = arith.constant 0 : i32
    return %arg1, %arg0 : i32, i32
  }
  func.func @transform_1(%arg0: i32, %arg1: i32) -> (i32, i32) {
    %c0_i32 = arith.constant 0 : i32
    %c0_i32_0 = arith.constant 0 : i32
    return %c0_i32, %arg0 : i32, i32
  }
  func.func @transform_2(%arg0: i32, %arg1: i32) -> (i32, i32) {
    %c0_i32 = arith.constant 0 : i32
    %c0_i32_0 = arith.constant 0 : i32
    return %c0_i32, %arg0 : i32, i32
  }
  func.func @transform_3(%arg0: i32, %arg1: i32) -> (i32, i32) {
    %c0_i32 = arith.constant 0 : i32
    return %arg1, %arg0 : i32, i32
  }
}

</mosaic_0001>

<bundles_post_ra>
// kernel: tpu_custom_call.1
= control target key start
LH: loop header
LB: loop body
LE: loop exit
PB: predicated region body
PF: predicated region fallthrough
CT: control target
= control target key end

     0   :  { %8 = vsyncpa [#allocation3], 0  ;;  %s198_s0 = inlined_call_operand.hbm [shape: f32[16,256], index: 0, kind: input, shape index: {}]   ;;  %s199_s1 = inlined_call_operand.vmem [shape: f32[1,256], index: 1, kind: input, shape index: {}]   ;;  %s200_s2 = inlined_call_operand.vmem [shape: f32[1,256], index: 2, kind: input, shape index: {}]   ;;  %s201_s3 = inlined_call_operand.hbm [shape: f32[16,256], index: 3, kind: output, shape index: {}]  }
   0x1   :  { %9 = vsyncpa [#allocation4], 0  ;;  %s138_s12 = smov [#allocation2]   ;;  %s90_s16 = scalar_lea.hbm %s198_s0, 512 }
   0x2   :  { %s15_s13 = sshll.u32 %s138_s12, 4  ;;  %p91_p0 = scmp.ne.s32.totalorder %s198_s0, %s90_s16  ;;  %s16_s13 = int_to_ptr.vmem [resolvable:$true] %s15_s13 }
   0x3   :  { %p94_p1 = scmp.lt.u32.totalorder %s90_s16, %s198_s0 }
   0x5   :  { %p96_p2 = pnand %p94_p1, %p91_p0 }
   0x7   :  { %99 = shalt.err (!%p96_p2)
}
   0x8   :  { %s100_s21 = scalar_lea.vmem %s16_s13, 512  ;;  %p105_p4 = scmp.lt.s32.totalorder %s16_s13, %s16_s13 }
   0x9   :  { %p101_p3 = scmp.ne.s32.totalorder %s16_s13, %s100_s21  ;;  %p106_p5 = scmp.lt.s32.totalorder %s100_s21, %s100_s21 }
   0xb   :  { %p107_p6 = por %p106_p5, %p105_p4 }
   0xd   :  { %p108_p7 = pnand %p107_p6, %p101_p3 }
   0xf   :  { %111 = shalt.err (!%p108_p7)
}
  0x10   :  { %s139_s22 = smov 256   ;;  %s140_s23 = smov 16  }
  0x11   :  { %21 = dma.hbm_to_vmem [thread:$0]  %s198_s0, 512, %s16_s13, [#allocation3], %s139_s22, %s139_s22, %s140_s23  }
  0x12   :  { %134 = dma.done.wait [#allocation3], 512  }
  0x13   :  { %135 = vsyncadd [#allocation3], 4294966784  ;;  %v35_v0 = vlaneseq  ;;  %v29_v4 = vld [vmem:[#allocation2] sm:$0xff]  ;;  %v30_v9 = vld [vmem:[#allocation2 + $0x8] sm:$0xff]  ;;  %s141_s0 = smov [#allocation5]  }
  0x14   :  { %v33_v5 = vld [vmem:[%s199_s1] sm:$0x3]  ;;  %v31_v12 = vld [vmem:[#allocation2 + $0x10] sm:$0xff]  ;;  %v32_v13 = vld [vmem:[#allocation2 + $0x18] sm:$0xff]  ;;  %s74_s30 = sshll.u32 %s141_s0, 4  ;;  %s75_s30 = int_to_ptr.vmem [resolvable:$true] %s74_s30 }
  0x15   :  { %v36_v1 = vshrl.u32 %v35_v0, 7  ;;  %v49_v6 = vld [vmem:[%s200_s2] sm:$0x3]  ;;  %s112_s1 = scalar_lea.vmem %s75_s30, 512  ;;  %p117_p9 = scmp.lt.s32.totalorder %s75_s30, %s75_s30 }
  0x16   :  { %p113_p8 = scmp.ne.s32.totalorder %s75_s30, %s112_s1  ;;  %p118_p10 = scmp.lt.s32.totalorder %s112_s1, %s112_s1 }
  0x17   :  { %v37_v2 = vsub.s32 0, %v36_v1  ;;  %v41_v3 = vsub.s32 1, %v36_v1 }
  0x18   :  { %p119_p11 = por %p118_p10, %p117_p9 }
  0x19   :  { %v38_v7 = vrot.slane %v33_v5, %v37_v2  ;;  %v54_v8 = vrot.slane %v49_v6, %v37_v2  ;;  %v42_v10 = vrot.slane %v33_v5, %v41_v3  ;;  %v58_v11 = vrot.slane %v49_v6, %v41_v3 }
  0x1a   :  { %p120_p12 = pnand %p119_p11, %p113_p8 }
  0x1b   :  { %v45_v14 = vsub.f32 %v29_v4, %v38_v7  ;;  %v46_v15 = vsub.f32 %v30_v9, %v42_v10  ;;  %v47_v16 = vsub.f32 %v31_v12, %v38_v7  ;;  %v48_v17 = vsub.f32 %v32_v13, %v42_v10 }
  0x1d   :  { %v61_v18 = vmul.f32 %v54_v8, %v45_v14  ;;  %v62_v19 = vmul.f32 %v58_v11, %v46_v15  ;;  %v63_v20 = vmul.f32 %v54_v8, %v47_v16  ;;  %v64_v21 = vmul.f32 %v58_v11, %v48_v17 }
  0x1f   :  { %65 = vst [vmem:[#allocation5] sm:$0xff] %v61_v18  ;;  %66 = vst [vmem:[#allocation5 + $0x8] sm:$0xff] %v62_v19 }
  0x20   :  { %67 = vst [vmem:[#allocation5 + $0x10] sm:$0xff] %v63_v20  ;;  %68 = vst [vmem:[#allocation5 + $0x18] sm:$0xff] %v64_v21 }
  0x21   :  { %123 = shalt.err (!%p120_p12)
}
  0x22   :  { %s124_s5 = scalar_lea.hbm %s201_s3, 512 }
  0x23   :  { %p125_p13 = scmp.ne.s32.totalorder %s201_s3, %s124_s5  ;;  %p128_p0 = scmp.lt.u32.totalorder %s124_s5, %s201_s3 }
  0x25   :  { %p130_p1 = pnand %p128_p0, %p125_p13 }
  0x27   :  { %133 = shalt.err (!%p130_p1)
}
  0x28   :  { %80 = dma.vmem_to_hbm [thread:$0]  %s75_s30, 512, %s201_s3, [#allocation4], %s139_s22, %s139_s22, %s140_s23  }
  0x29   :  { %136 = dma.done.wait [#allocation4], 512  }
  0x2a   :  { %137 = vsyncadd [#allocation4], 4294966784 }
  0x2b   :  { %84 = vsyncpa [#allocation3], 1 }
  0x2c   :  { %85 = vsyncpa [#allocation4], 1 }

</bundles_post_ra>
